<compile_context>
chip_gen: v6e
topology: v6e:2x2x1
jax: 0.10.0
libtpu: 0.0.40
codegen_flags: <defaults>
</compile_context>

<pallas_src>
import functools
import math

import jax
import jax.numpy as jnp
from jax.experimental import pallas as pl
from jax.experimental.pallas import tpu as pltpu


def _gates_from_pre(pre, h):
    """pre: (rows, 4H) fused pre-activation -> (z, u)."""
    r = jax.nn.sigmoid(pre[:, 0:h])
    z = jax.nn.sigmoid(pre[:, h:2 * h])
    u = jnp.tanh(pre[:, 2 * h:3 * h] + r * pre[:, 3 * h:4 * h])
    return z, u


def _path_update_kernel(pi_ref, pj_ref, hx_ref, wh_ref, b_ref, out_ref):
    """One (batch, i-tile) step.  Rows of the tile are (i_local, j) pairs."""
    f32 = jnp.float32
    ti, g = pi_ref.shape
    n = pj_ref.shape[0]
    h = out_ref.shape[-1]

    # Rebuild the per-pair x contribution in VMEM: xc[i_local*N + j, :] =
    # pi[i_local] + pj[j].  (8-aligned sublane dims -> cheap reshape.)
    xc = (pi_ref[...].astype(f32)[:, None, :]
          + pj_ref[...].astype(f32)[None, :, :]).reshape(ti * n, g)

    hx = hx_ref[...].astype(f32)                       # (tm, H), f32 math
    pre = (xc
           + jnp.dot(hx, wh_ref[...].astype(f32), preferred_element_type=f32)
           + b_ref[...].astype(f32))                   # (tm, 4H)

    z, u = _gates_from_pre(pre, h)
    out_ref[...] = (z * hx + (1.0 - z) * u).astype(out_ref.dtype)


def _path_update_kernel_nohx(pi_ref, pj_ref, b_ref, out_ref):
    """hx is None (== zeros): no hx stream, no hx matmul, no z*hx term."""
    f32 = jnp.float32
    ti, g = pi_ref.shape
    n = pj_ref.shape[0]
    h = out_ref.shape[-1]

    xc = (pi_ref[...].astype(f32)[:, None, :]
          + pj_ref[...].astype(f32)[None, :, :]).reshape(ti * n, g)
    pre = xc + b_ref[...].astype(f32)
    z, u = _gates_from_pre(pre, h)
    out_ref[...] = ((1.0 - z) * u).astype(out_ref.dtype)


def _choose_ti(n, target_rows):
    """Largest divisor of N (multiple of 8) with ti*N <= target_rows."""
    cands = [d for d in range(8, n + 1, 8) if n % d == 0]
    if not cands:
        raise ValueError("N must have a divisor that is a multiple of 8")
    fitting = [d for d in cands if d * n <= target_rows]
    return max(fitting) if fitting else min(cands)


@functools.partial(jax.jit, static_argnames=("stream_dtype", "target_rows"))
def path_update_forward(nodes, bias, hx, params, *,
                        stream_dtype=jnp.bfloat16, target_rows=2048):
    """nodes: (B,N,X), bias: (B,N,N,H), hx: (B,N,N,H) or None."""
    B, N, X = nodes.shape
    H = bias.shape[-1]
    G = 4 * H
    assert N % 8 == 0, "TODO(synk): pad N to a multiple of 8 for general shapes"

    f32 = jnp.float32
    (wr, br), (wz, bz), (wc, bc), (wu, bu) = params

    # Fused weights: columns = [r | z | c | u] gates (width 4H).
    wx4 = jnp.concatenate(
        [wr[:2 * X], wz[:2 * X], wc, jnp.zeros((2 * X, H), f32)], axis=1)  # (2X,4H)
    wh4 = jnp.concatenate(
        [wr[2 * X:], wz[2 * X:], jnp.zeros((H, H), f32), wu], axis=1)      # (H, 4H)
    b4 = jnp.concatenate([br, bz, bc, bu]).reshape(1, G)                   # (1, 4H)

    # Tiny per-node projections replacing the (B,N,N,2X) pair tensor.
    nodes2 = nodes.reshape(B * N, X).astype(f32)
    pj2 = (nodes2 @ wx4[:X]).astype(stream_dtype)        # used in the "j" role
    pi2 = (nodes2 @ wx4[X:2 * X]).astype(stream_dtype)   # used in the "i" role

    ti = _choose_ti(N, target_rows)
    n_it = N // ti
    tm = ti * N                       # rows per grid step
    M = B * N * N
    grid = (B, n_it)

    row_map = lambda b, it: (b * n_it + it, 0)

    in_specs = [
        pl.BlockSpec((ti, G), row_map),                 # pi  (rows b*N+it*ti ..)
        pl.BlockSpec((N, G), lambda b, it: (b, 0)),     # pj  (all j of batch b)
    ]
    args = [pi2, pj2]

    if hx is not None:
        hx2 = hx.reshape(M, H).astype(stream_dtype)
        in_specs.append(pl.BlockSpec((tm, H), row_map))             # hx rows
        args.append(hx2)
        in_specs.append(pl.BlockSpec((H, G), lambda b, it: (0, 0)))  # wh4
        args.append(wh4)
        kernel = _path_update_kernel
    else:
        kernel = _path_update_kernel_nohx

    in_specs.append(pl.BlockSpec((1, G), lambda b, it: (0, 0)))      # bias
    args.append(b4)

    out2 = pl.pallas_call(
        kernel,
        out_shape=jax.ShapeDtypeStruct((M, H), jnp.float32),
        grid=grid,
        in_specs=in_specs,
        out_specs=pl.BlockSpec((tm, H), row_map),
        compiler_params=pltpu.CompilerParams(
            dimension_semantics=("parallel", "parallel")),
    )(*args)

    return out2.reshape(B, N, N, H)


def _init_linear(key, in_dim, out_dim):
    # PyTorch-style uniform(-1/sqrt(in), 1/sqrt(in)) init, deterministic.
    kw, kb = jax.random.split(key)
    bound = 1.0 / math.sqrt(in_dim)
    w = jax.random.uniform(kw, (in_dim, out_dim), jnp.float32, -bound, bound)
    b = jax.random.uniform(kb, (out_dim,), jnp.float32, -bound, bound)
    return w, b


def _reference(nodes, bias, hx, params):
    B, N, X = nodes.shape
    H = bias.shape[-1]
    if hx is None:
        hx = jnp.zeros_like(bias)
    nj = jnp.broadcast_to(nodes[:, None, :, :], (B, N, N, X))
    ni = jnp.broadcast_to(nodes[:, :, None, :], (B, N, N, X))
    pairs = jnp.concatenate([nj, ni], axis=-1)
    (wr, br), (wz, bz), (wc, bc), (wu, bu) = params
    rz_in = jnp.concatenate([pairs, hx], axis=-1)
    r = jax.nn.sigmoid(rz_in @ wr + br)
    z = jax.nn.sigmoid(rz_in @ wz + bz)
    u = jnp.tanh(pairs @ wc + bc + r * (hx @ wu + bu))
    return z * hx + (1.0 - z) * u


if __name__ == "__main__":
    B, N, X, H = 2, 8, 32, 32  # hidden_size=32, path_hidden_size=32

    key = jax.random.PRNGKey(0)
    k_nodes, k_bias, k_hx, k_r, k_z, k_c, k_u = jax.random.split(key, 7)

    nodes = jax.random.normal(k_nodes, (B, N, X), jnp.float32)
    bias = jax.random.normal(k_bias, (B, N, N, H), jnp.float32)
    hx = jax.random.normal(k_hx, (B, N, N, H), jnp.float32)

    params = (
        _init_linear(k_r, 2 * X + H, H),  # self.r
        _init_linear(k_z, 2 * X + H, H),  # self.z
        _init_linear(k_c, 2 * X, H),      # self.c
        _init_linear(k_u, H, H),          # self.u
    )

    # Fast path: bf16-streamed inputs (default).
    out_bf16 = jax.block_until_ready(path_update_forward(nodes, bias, hx, params))
    # Validation path: f32-streamed inputs, tight tolerance.
    out_f32 = jax.block_until_ready(
        path_update_forward(nodes, bias, hx, params, stream_dtype=jnp.float32))
    # hx=None path (skips hx stream / hx matmul / z*hx).
    out_none = jax.block_until_ready(
        path_update_forward(nodes, bias, None, params, stream_dtype=jnp.float32))

    ref = _reference(nodes, bias, hx, params)
    ref_none = _reference(nodes, bias, None, params)

    assert out_f32.shape == (B, N, N, H)
    assert jnp.allclose(out_f32, ref, atol=1e-4, rtol=1e-4), "f32 path mismatch"
    assert jnp.allclose(out_none, ref_none, atol=1e-4, rtol=1e-4), "hx=None path mismatch"
    bf16_err = float(jnp.max(jnp.abs(out_bf16 - ref)))
    assert bf16_err < 1e-1, f"bf16 streaming path deviates too much: {bf16_err}"

    print("KERNEL_OK")
</pallas_src>

<mosaic_0001>
module attributes {stable_mosaic.version = 11 : i64} {
  func.func @_path_update_kernel(%arg0: i32, %arg1: i32, %arg2: memref<8x128xbf16, #tpu.memory_space<vmem>>, %arg3: memref<8x128xbf16, #tpu.memory_space<vmem>>, %arg4: memref<64x32xbf16, #tpu.memory_space<vmem>>, %arg5: memref<32x128xf32, #tpu.memory_space<vmem>>, %arg6: memref<1x128xf32, #tpu.memory_space<vmem>>, %arg7: memref<64x32xf32, #tpu.memory_space<vmem>>) attributes {dimension_semantics = [#tpu.dimension_semantics<parallel>, #tpu.dimension_semantics<parallel>], iteration_bounds = array<i64: 2, 1>, scalar_prefetch = 0 : i64, scratch_operands = 0 : i64, tpu.core_type = #tpu.core_type<tc>, window_params = [{transform_indices = @transform_0, window_bounds = array<i64: 8, 128>}, {transform_indices = @transform_1, window_bounds = array<i64: 8, 128>}, {transform_indices = @transform_2, window_bounds = array<i64: 64, 32>}, {pipeline_mode = #tpu.pipeline_mode<synchronous>, transform_indices = @transform_3, window_bounds = array<i64: 32, 128>}, {pipeline_mode = #tpu.pipeline_mode<synchronous>, transform_indices = @transform_4, window_bounds = array<i64: 1, 128>}, {transform_indices = @transform_5, window_bounds = array<i64: 64, 32>}]} {
    %c0 = arith.constant 0 : index
    %c0_0 = arith.constant 0 : index
    %0 = vector.load %arg2[%c0, %c0_0] : memref<8x128xbf16, #tpu.memory_space<vmem>>, vector<8x128xbf16>
    %1 = arith.extf %0 : vector<8x128xbf16> to vector<8x128xf32>
    %2 = vector.shape_cast %1 : vector<8x128xf32> to vector<8x1x128xf32>
    %c0_1 = arith.constant 0 : index
    %c0_2 = arith.constant 0 : index
    %3 = vector.load %arg3[%c0_1, %c0_2] : memref<8x128xbf16, #tpu.memory_space<vmem>>, vector<8x128xbf16>
    %4 = arith.extf %3 : vector<8x128xbf16> to vector<8x128xf32>
    %5 = vector.shape_cast %4 : vector<8x128xf32> to vector<1x8x128xf32>
    %6 = vector.broadcast %2 : vector<8x1x128xf32> to vector<8x8x128xf32>
    %7 = vector.broadcast %5 : vector<1x8x128xf32> to vector<8x8x128xf32>
    %8 = arith.addf %6, %7 : vector<8x8x128xf32>
    %9 = vector.shape_cast %8 : vector<8x8x128xf32> to vector<64x128xf32>
    %c0_3 = arith.constant 0 : index
    %c0_4 = arith.constant 0 : index
    %10 = vector.load %arg4[%c0_3, %c0_4] : memref<64x32xbf16, #tpu.memory_space<vmem>>, vector<64x32xbf16>
    %11 = arith.extf %10 : vector<64x32xbf16> to vector<64x32xf32>
    %c0_5 = arith.constant 0 : index
    %c0_6 = arith.constant 0 : index
    %12 = vector.load %arg5[%c0_5, %c0_6] : memref<32x128xf32, #tpu.memory_space<vmem>>, vector<32x128xf32>
    %cst = arith.constant dense<0.000000e+00> : vector<64x128xf32>
    %13 = tpu.matmul %11, %12, %cst {dimension_numbers = #tpu.dot_dimension_numbers<[1], [0], [0], [1], [0, 0, 1, 1], [], []>} : vector<64x32xf32>, vector<32x128xf32>, vector<64x128xf32> -> vector<64x128xf32>
    %14 = arith.addf %9, %13 : vector<64x128xf32>
    %c0_7 = arith.constant 0 : index
    %c0_8 = arith.constant 0 : index
    %15 = vector.load %arg6[%c0_7, %c0_8] : memref<1x128xf32, #tpu.memory_space<vmem>>, vector<1x128xf32>
    %16 = vector.broadcast %15 : vector<1x128xf32> to vector<64x128xf32>
    %17 = arith.addf %14, %16 : vector<64x128xf32>
    %18 = vector.extract_strided_slice %17 {offsets = [0, 0], sizes = [64, 32], strides = [1, 1]} : vector<64x128xf32> to vector<64x32xf32>
    %19 = arith.negf %18 : vector<64x32xf32>
    %20 = math.exp %19 : vector<64x32xf32>
    %cst_9 = arith.constant 1.000000e+00 : f32
    %21 = vector.broadcast %cst_9 : f32 to vector<64x32xf32>
    %22 = arith.addf %21, %20 : vector<64x32xf32>
    %23 = arith.divf %21, %22 : vector<64x32xf32>
    %24 = vector.extract_strided_slice %17 {offsets = [0, 32], sizes = [64, 32], strides = [1, 1]} : vector<64x128xf32> to vector<64x32xf32>
    %25 = arith.negf %24 : vector<64x32xf32>
    %26 = math.exp %25 : vector<64x32xf32>
    %cst_10 = arith.constant 1.000000e+00 : f32
    %27 = vector.broadcast %cst_10 : f32 to vector<64x32xf32>
    %28 = arith.addf %27, %26 : vector<64x32xf32>
    %29 = arith.divf %27, %28 : vector<64x32xf32>
    %30 = vector.extract_strided_slice %17 {offsets = [0, 64], sizes = [64, 32], strides = [1, 1]} : vector<64x128xf32> to vector<64x32xf32>
    %31 = vector.extract_strided_slice %17 {offsets = [0, 96], sizes = [64, 32], strides = [1, 1]} : vector<64x128xf32> to vector<64x32xf32>
    %32 = arith.mulf %23, %31 : vector<64x32xf32>
    %33 = arith.addf %30, %32 : vector<64x32xf32>
    %34 = math.tanh %33 : vector<64x32xf32>
    %35 = arith.mulf %29, %11 : vector<64x32xf32>
    %cst_11 = arith.constant 1.000000e+00 : f32
    %36 = vector.broadcast %cst_11 : f32 to vector<64x32xf32>
    %37 = arith.subf %36, %29 : vector<64x32xf32>
    %38 = arith.mulf %37, %34 : vector<64x32xf32>
    %39 = arith.addf %35, %38 : vector<64x32xf32>
    %c0_12 = arith.constant 0 : index
    %c0_13 = arith.constant 0 : index
    %40 = vector.load %arg7[%c0_12, %c0_13] : memref<64x32xf32, #tpu.memory_space<vmem>>, vector<64x32xf32>
    tpu.vector_store %arg7[%c0_12, %c0_13], %39 {strides = array<i32>} : memref<64x32xf32, #tpu.memory_space<vmem>>, vector<64x32xf32>,
    return
  }
  func.func @transform_0(%arg0: i32, %arg1: i32) -> (i32, i32) {
    %c1_i32 = arith.constant 1 : i32
    %0 = arith.muli %arg0, %c1_i32 : i32
    %1 = arith.addi %0, %arg1 : i32
    %c0_i32 = arith.constant 0 : i32
    %c0_i32_0 = arith.constant 0 : i32
    return %1, %c0_i32 : i32, i32
  }
  func.func @transform_1(%arg0: i32, %arg1: i32) -> (i32, i32) {
    %c0_i32 = arith.constant 0 : i32
    %c0_i32_0 = arith.constant 0 : i32
    return %arg0, %c0_i32 : i32, i32
  }
  func.func @transform_2(%arg0: i32, %arg1: i32) -> (i32, i32) {
    %c1_i32 = arith.constant 1 : i32
    %0 = arith.muli %arg0, %c1_i32 : i32
    %1 = arith.addi %0, %arg1 : i32
    %c0_i32 = arith.constant 0 : i32
    %c0_i32_0 = arith.constant 0 : i32
    return %1, %c0_i32 : i32, i32
  }
  func.func @transform_3(%arg0: i32, %arg1: i32) -> (i32, i32) {
    %c0_i32 = arith.constant 0 : i32
    %c0_i32_0 = arith.constant 0 : i32
    %c0_i32_1 = arith.constant 0 : i32
    return %c0_i32, %c0_i32_0 : i32, i32
  }
  func.func @transform_4(%arg0: i32, %arg1: i32) -> (i32, i32) {
    %c0_i32 = arith.constant 0 : i32
    %c0_i32_0 = arith.constant 0 : i32
    %c0_i32_1 = arith.constant 0 : i32
    return %c0_i32, %c0_i32_0 : i32, i32
  }
  func.func @transform_5(%arg0: i32, %arg1: i32) -> (i32, i32) {
    %c1_i32 = arith.constant 1 : i32
    %0 = arith.muli %arg0, %c1_i32 : i32
    %1 = arith.addi %0, %arg1 : i32
    %c0_i32 = arith.constant 0 : i32
    %c0_i32_0 = arith.constant 0 : i32
    return %1, %c0_i32 : i32, i32
  }
}

</mosaic_0001>

<bundles_post_ra>
// kernel: path_update_forward.1
= control target key start
LH: loop header
LB: loop body
LE: loop exit
PB: predicated region body
PF: predicated region fallthrough
CT: control target
= control target key end

     0   :  { %10 = vsyncpa [#allocation3], 0  ;;  %s1564_s0 = inlined_call_operand.vmem [shape: bf16[16,128], index: 0, kind: input, shape index: {}]   ;;  %s1565_s1 = inlined_call_operand.vmem [shape: bf16[16,128], index: 1, kind: input, shape index: {}]   ;;  %s1566_s2 = inlined_call_operand.vmem [shape: bf16[128,32], index: 2, kind: input, shape index: {}]   ;;  %s1567_s3 = inlined_call_operand.vmem [shape: f32[32,128], index: 3, kind: input, shape index: {}]   ;;  %s1568_s4 = inlined_call_operand.vmem [shape: f32[1,128], index: 4, kind: input, shape index: {}]   ;;  %s1569_s5 = inlined_call_operand.hbm [shape: f32[128,32], index: 5, kind: output, shape index: {}]  }
   0x1   :  { %12 = vsyncpa [#allocation3 + $0x1], 0  ;;  %s1274_s18 = smov 0   ;;  %s1276_s19 = smov 0  }
   0x2   :  { %s1278_s20 = smov 0   ;;  %s1280_s21 = smov 0  }
   0x3   :  { %s1282_s22 = smov 0   ;;  %s1284_s23 = smov 0  }
   0x4 LB: > { %s938_s24 = sadd.s32 4294967295, %s1235_s23   ;;  %s939_s25 = sadd.s32 4294967294, %s1235_s23   ;;  %s1235_s23 = sphi %s1284_s23, %s18_s23   ;;  %s1231_s22 = sphi %s1282_s22, %s1576_s22   ;;  %s1227_s21 = sphi %s1280_s21, %s1575_s21   ;;  %s1223_s20 = sphi %s1278_s20, %s1574_s20   ;;  %s1219_s19 = sphi %s1276_s19, %s1573_s19   ;;  %s1215_s18 = sphi %s1274_s18, %s1572_s18  }
   0x5   : > { %s30_s26 = sadd.s32 1, %s1231_s22  ;;  %s163_s27 = sadd.s32 1, %s1223_s20 }
   0x6   : > { %p32_p0 = scmp.ge.s32.totalorder %s30_s26, 2  ;;  %p173_p1 = scmp.ne.s32.totalorder %s1223_s20, %s1219_s19 }
   0x7   : > { %p174_p2 = scmp.eq.s32.totalorder %s938_s24, 1  ;;  %p179_p3 = scmp.ne.s32.totalorder %s1219_s19, %s1215_s18 }
   0x8   : > { %s1578_s26 = smov (%p32_p0, %s30_s26), 0  ;;  %p180_p5 = scmp.eq.s32.totalorder %s939_s25, 1 }
   0x9   : > { %p1314_p4 = por %p174_p2, %p173_p1  ;;  %s160_s29 = ssub.s32 %s1231_s22, %s1578_s26 }
   0xa   : > { %p942_p6 = scmp.ge.s32.totalorder %s1235_s23, 1  ;;  %p161_p7 = scmp.eq.s32.totalorder %s160_s29, 0 }
   0xb   : > { %p1321_p8 = por %p180_p5, %p179_p3  ;;  %p231_p9 = scmp.lt.s32.totalorder %s1235_s23, 3 }
   0xc   : > { %s1327_s6 = scalar_select %p161_p7, %s1223_s20, %s163_s27  }
   0xd   : > { %p232_p10 = pnand %p942_p6, %p231_p9 }
   0xe   : > { %s946_s11 = sshll.u32 (!%p232_p10), %s1227_s21, 3  ;;  %p270_p12 = scmp.lt.s32.totalorder (!%p232_p10), %s1227_s21, 1 }
   0xf   : > { %235 = sbr.rel (%p232_p10) target bundleno = 739 (0x2e3), region = 40  ;;  %p281_p11 = scmp.lt.s32.totalorder (!%p232_p10), %s946_s11, 15 }
  0x10   : > { %s1238_s15 = smov (!%p232_p10), 32   ;;  %s1240_s17 = smov (!%p232_p10), 96  }
  0x11   : > { %s266_s24 = sand.u32 (!%p232_p10), 1, %s1219_s19  }
  0x14   : > { %v410_v0 = vld [vmem:[%s1567_s3 + $0x18] sm:$0xff]  ;;  %v409_v1 = vld [vmem:[%s1567_s3 + $0x10] sm:$0xff]  ;;  %v408_v2 = vld [vmem:[%s1567_s3 + $0x8] sm:$0xff]  ;;  %s1580_s11 = smov (!%p281_p11, %s946_s11), 15  ;;  %vm411_vm0 = vcmask 261120   ;;  %v296_v20 = vlaneseq }
  0x15   : > { %1002 = vmatprep.subr.mxu0 %v410_v0  ;;  %1022 = vmatprep.subr.mxu1 %v410_v0  ;;  %v407_v3 = vld [vmem:[%s1567_s3] sm:$0xff]  ;;  %s947_s16 = sshll.u32 %s1580_s11, 2  ;;  %v1237_v18 = vmov 1966171168  }
  0x16   : > { %1003 = vmatpush3.msra.mxu0 %v410_v0  ;;  %1026 = vmatpush3.msra.mxu1 %v410_v0  ;;  %s284_s25 = scalar_lea.vmem %s1566_s2, %s947_s16  ;;  %v294_v19 = vunpack.c.l.s4 %v1237_v18  ;;  %v297_v24 = vshrl.u32 %v296_v20, 7  ;;  %v956_v52 = vld [vmem:[%s1568_s4] ss:$0 sm:$0xff]  ;;  %s1239_s16 = smov 64  }
  0x17   : > { %1004 = vmatprep.subr.mxu0 %v409_v1  ;;  %1023 = vmatprep.subr.mxu1 %v409_v1  ;;  %v972_v4 = vld [vmem:[%s284_s25] sm:$0xff]   ;;  %v988_v5 = vld [vmem:[%s284_s25 + $0x10] sm:$0xff]   ;;  %v1345_v6 = vld [vmem:[%s284_s25 + $0x8] sm:$0xff]   ;;  %s271_s27 = scalar_select %p270_p12, %s1227_s21, 1 }
  0x18   : > { %1005 = vmatpush3.msra.mxu0 %v409_v1  ;;  %1027 = vmatpush3.msra.mxu1 %v409_v1  ;;  %v973_v7 = vunpack.c.l.bf16 %v972_v4  ;;  %v974_v8 = vunpack.c.h.bf16 %v972_v4  ;;  %v981_v9 = vunpack.c.l.bf16 %v988_v5  ;;  %v982_v10 = vunpack.c.h.bf16 %v988_v5  ;;  %v1347_v11 = vld [vmem:[%s284_s25 + $0x18] sm:$0xff]   ;;  %s943_s25 = sshll.u32 %s266_s24, 6 }
  0x19   : > { %1006 = vmatprep.subr.mxu0 %v408_v2  ;;  %1024 = vmatprep.subr.mxu1 %v408_v2  ;;  %v977_v12 = vunpack.c.l.bf16 %v1345_v6  ;;  %v985_v13 = vunpack.c.l.bf16 %v1347_v11  ;;  %v978_v16 = vunpack.c.h.bf16 %v1345_v6  ;;  %v986_v17 = vunpack.c.h.bf16 %v1347_v11  ;;  %s944_s29 = sshll.u32 %s271_s27, 2  ;;  %s268_s27 = scalar_lea.vmem [#allocation2], %s943_s25 }
  0x1a   : > { %1007 = vmatpush3.msra.mxu0 %v408_v2  ;;  %1028 = vmatpush3.msra.mxu1 %v408_v2  ;;  %v1351_v14 = vpack.i.bf16 %v974_v8, %v973_v7  ;;  %v1354_v15 = vpack.i.bf16 %v982_v10, %v981_v9  ;;  %s273_s9 = scalar_lea.vmem %s1564_s0, %s944_s29  ;;  %v295_v23 = vunpack.c.0.s8 %v294_v19  ;;  %s278_s12 = scalar_lea.vmem %s1565_s1, %s944_s29  ;;  %v345_v32 = vsub.s32 0, %v297_v24 }
  0x1b   : > { %1008 = vmatprep.subr.mxu0 %v407_v3  ;;  %1025 = vmatprep.subr.mxu1 %v407_v3  ;;  %v289_v21 = vld [vmem:[%s273_s9] sm:$0xf]  ;;  %s970_s29 = sshll.u32 %s1227_s21, 10  ;;  %s843_s7 = sshll.u32 %s268_s27, 4  ;;  %s1516_s7 = int_to_ptr.vmem [resolvable:$true] %s843_s7 }
  0x1c   : > { %1009 = vmatpush3.msra.mxu0 %v407_v3  ;;  %1029 = vmatpush3.msra.mxu1 %v407_v3  ;;  %v290_v22 = vunpack.c.l.bf16 %v289_v21  ;;  %v298_v25 = vsub.s32 %v295_v23, %v297_v24  ;;  %v341_v34 = vld [vmem:[%s278_s12] sm:$0xf]  ;;  %s1514_s10 = scalar_lea.hbm %s1569_s5, %s970_s29  ;;  %s1519_s21 = scalar_lea.sflag [#allocation3], %s266_s24 }
  0x1d   : > { %1010 = vmatprep.mubr.msk.f32.mxu0 %vm411_vm0, %v973_v7  ;;  %1016 = vmatprep.mubr.msk.f32.mxu1 %vm411_vm0, %v981_v9  ;;  %v342_v37 = vunpack.c.l.bf16 %v341_v34  ;;  %s1159_s11 = scalar_lea.vmem %s1516_s7, 1024  ;;  %s1241_s12 = smov [#allocation2]  }
  0x1e   : > { %1011 = vmatmul.mubr.msk.f32.vlgmr.msra.gmra.mxu0 %vm411_vm0, %v974_v8  ;;  %1017 = vmatmul.mubr.msk.f32.vlgmr.msra.gmra.mxu1 %vm411_vm0, %v982_v10  ;;  %v292_v26 = vcombine.high %v290_v22, %v290_v22  ;;  %v299_v27 = vrot.slane %v290_v22, %v298_v25  ;;  %p1160_p13 = scmp.ne.s32.totalorder %s1516_s7, %s1159_s11  ;;  %s1163_s13 = sshll.u32 %s1241_s12, 4  ;;  %s1164_s13 = int_to_ptr.vmem [resolvable:$false] %s1163_s13 }
  0x1f   : > { %1013 = vmatprep.mubr.msk.f32.mxu0 %vm411_vm0, %v977_v12  ;;  %1019 = vmatprep.mubr.msk.f32.mxu1 %vm411_vm0, %v985_v13  ;;  %s1165_s14 = scalar_lea.vmem %s1164_s13, 2048  ;;  %p1166_p2 = scmp.lt.s32.totalorder %s1516_s7, %s1164_s13 }
  0x20   : > { %v306_v28 = vrot.slane %v292_v26, %v298_v25  ;;  %v307_v29 = vcombine.high %v299_v27, %v299_v27  ;;  %v315_v35 = vrot.slane %v299_v27, %v298_v25  ;;  %p1161_p0 = pnand %p1160_p13, %p1314_p4  ;;  %p1167_p3 = scmp.lt.s32.totalorder %s1165_s14, %s1159_s11 }
  0x22   : > { %1014 = vmatmul.mubr.msk.f32.gmra.mxu0 %vm411_vm0, %v978_v16  ;;  %1020 = vmatmul.mubr.msk.f32.gmra.mxu1 %vm411_vm0, %v986_v17  ;;  %v308_v30 = vcombine.high %v306_v28, %v306_v28  ;;  %v329_v31 = vrot.slane %v307_v29, %v298_v25  ;;  %v322_v40 = vrot.slane %v306_v28, %v298_v25  ;;  %p1162_p1 = pneg %p1161_p0  ;;  %p1168_p5 = por %p1167_p3, %p1166_p2 }
  0x23   : > { %v346_v41 = vrot.slane %v315_v35, %v345_v32  ;;  %v337_v42 = vcombine.high %v315_v35, %v315_v35 }
  0x24   : > { %v336_v33 = vrot.slane %v308_v30, %v298_v25  ;;  %v339_v36 = vcombine.high %v329_v31, %v329_v31  ;;  %v350_v38 = vrot.slane %v329_v31, %v345_v32  ;;  %v338_v47 = vcombine.high %v322_v40, %v322_v40  ;;  %p1169_p6 = pnand %p1168_p5, %p1162_p1 }
  0x25   : > { %v362_v48 = vrot.slane %v322_v40, %v345_v32  ;;  %v383_v49 = vadd.f32 %v346_v41, %v342_v37  ;;  %v354_v50 = vrot.slane %v337_v42, %v345_v32 }
  0x26   : > { %v366_v39 = vrot.slane %v336_v33, %v345_v32  ;;  %v358_v43 = vrot.slane %v339_v36, %v345_v32  ;;  %v384_v44 = vadd.f32 %v350_v38, %v342_v37  ;;  %v340_v46 = vcombine.high %v336_v33, %v336_v33 }
  0x27   : > { %v370_v58 = vrot.slane %v338_v47, %v345_v32  ;;  %v387_v60 = vadd.f32 %v362_v48, %v342_v37  ;;  %v385_v1 = vadd.f32 %v354_v50, %v342_v37 }
  0x28   : > { %v388_v45 = vadd.f32 %v366_v39, %v342_v37  ;;  %v386_v54 = vadd.f32 %v358_v43, %v342_v37  ;;  %v374_v57 = vrot.slane %v340_v46, %v345_v32 }
  0x29   : > { %v389_v7 = vadd.f32 %v370_v58, %v342_v37 }
  0x2a   : > { %v390_v5 = vadd.f32 %v374_v57, %v342_v37 }
  0xde   : > { %v1012_v51 = vpop.f32.mrf.mxu0  ;;  %v1018_v53 = vpop.f32.mrf.mxu1 }
  0xdf   : > { %v542_v55 = vadd.f32 %v1012_v51, %v384_v44  ;;  %v546_v56 = vadd.f32 %v1018_v53, %v388_v45 }
  0xe0   : > { %v502_v59 = vpop.f32.mrf.mxu0  ;;  %v522_v61 = vpop.f32.mrf.mxu1 }
  0xe1   : > { %v1384_v62 = vadd.f32 %v956_v52, %v542_v55  ;;  %v1386_v63 = vadd.f32 %v956_v52, %v546_v56  ;;  %v541_v0 = vadd.f32 %v502_v59, %v383_v49  ;;  %v545_v19 = vadd.f32 %v522_v61, %v387_v60 }
  0xe2   : > { %v1015_v2 = vpop.f32.mrf.mxu0  ;;  %v1021_v3 = vpop.f32.mrf.mxu1 }
  0xe3   : > { %v544_v4 = vadd.f32 %v1015_v2, %v386_v54  ;;  %622 = vrot.lane.b32.xlu0 %v1384_v62, %s1238_s15  ;;  %630 = vrot.lane.b32.xlu1 %v1386_v63, %s1238_s15  ;;  %v1392_v10 = vadd.f32 %v956_v52, %v541_v0  ;;  %v548_v22 = vadd.f32 %v1021_v3, %v390_v5  ;;  %v958_v27 = vmul.f32 -1.442695, %v1384_v62 }
  0xe4   : > { %v512_v8 = vpop.f32.mrf.mxu0  ;;  %v532_v9 = vpop.f32.mrf.mxu1  ;;  %v1402_v24 = vadd.f32 %v956_v52, %v545_v19  ;;  %v962_v28 = vmul.f32 -1.442695, %v1386_v63 }
  0xe5   : > { %v1394_v18 = vadd.f32 %v956_v52, %v544_v4  ;;  %v543_v20 = vadd.f32 %v512_v8, %v385_v1  ;;  %v547_v23 = vadd.f32 %v532_v9, %v389_v7  ;;  %v1404_v25 = vadd.f32 %v956_v52, %v548_v22 }
  0xe6   : > { %1111 = vpow2.f32 %v958_v27  ;;  %v957_v29 = vmul.f32 -1.442695, %v1392_v10  ;;  %v961_v30 = vmul.f32 -1.442695, %v1402_v24  ;;  %v1096_v22 = vpack.i.bf16 %v978_v16, %v977_v12 }
  0xe7   : > { %v1396_v21 = vadd.f32 %v956_v52, %v543_v20  ;;  %620 = vrot.lane.b32.xlu0 %v1392_v10, %s1238_s15  ;;  %626 = vrot.lane.b32.xlu1 %v1394_v18, %s1238_s15  ;;  %v1406_v26 = vadd.f32 %v956_v52, %v547_v23  ;;  %1113 = vpow2.f32 %v962_v28  ;;  %v960_v31 = vmul.f32 -1.442695, %v1394_v18 }
  0xe8   : > { %1115 = vpow2.f32 %v957_v29  ;;  %v964_v32 = vmul.f32 -1.442695, %v1404_v25  ;;  %v1106_v28 = vpack.i.bf16 %v986_v17, %v985_v13 }
  0xe9   : > { %1117 = vpow2.f32 %v961_v30  ;;  %v959_v33 = vmul.f32 -1.442695, %v1396_v21  ;;  %v963_v34 = vmul.f32 -1.442695, %v1406_v26 }
  0xea   : > { %1119 = vpow2.f32 %v960_v31 }
  0xeb   : > { %628 = vrot.lane.b32.xlu0 %v1402_v24, %s1238_s15  ;;  %624 = vrot.lane.b32.xlu1 %v1396_v21, %s1238_s15  ;;  %1121 = vpow2.f32 %v964_v32 }
  0xec   : > { %1123 = vpow2.f32 %v959_v33 }
  0xed   : > { %1125 = vpow2.f32 %v963_v34 }
  0xef   : > { %632 = vrot.lane.b32.xlu0 %v1406_v26, %s1238_s15  ;;  %634 = vrot.lane.b32.xlu1 %v1404_v25, %s1238_s15 }
  0xf3   : > { %v1112_v35 = vpop.eup %1111 }
  0xf4   : > { %v1114_v36 = vpop.eup %1113  ;;  %v589_v37 = vadd.f32 1.0, %v1112_v35 }
  0xf5   : > { %v1116_v38 = vpop.eup %1115  ;;  %v593_v39 = vadd.f32 1.0, %v1114_v36 }
  0xf6   : > { %v1118_v40 = vpop.eup %1117  ;;  %1127 = vrcp.f32 %v589_v37  ;;  %v588_v41 = vadd.f32 1.0, %v1116_v38 }
  0xf7   : > { %v1120_v42 = vpop.eup %1119  ;;  %1129 = vrcp.f32 %v593_v39  ;;  %v592_v43 = vadd.f32 1.0, %v1118_v40 }
  0xf8   : > { %v1122_v44 = vpop.eup %1121  ;;  %1131 = vrcp.f32 %v588_v41  ;;  %v591_v45 = vadd.f32 1.0, %v1120_v42 }
  0xf9   : > { %v1124_v46 = vpop.eup %1123  ;;  %1133 = vrcp.f32 %v592_v43  ;;  %v595_v47 = vadd.f32 1.0, %v1122_v44 }
  0xfa   : > { %1135 = vrcp.f32 %v591_v45  ;;  %v590_v48 = vadd.f32 1.0, %v1124_v46  ;;  %v1126_v49 = vpop.eup %1125 }
  0xfb   : > { %1137 = vrcp.f32 %v595_v47  ;;  %v594_v50 = vadd.f32 1.0, %v1126_v49 }
  0xfc   : > { %1139 = vrcp.f32 %v590_v48 }
  0xfd   : > { %1141 = vrcp.f32 %v594_v50 }
 0x103   : > { %v1424_v51 = vpop.eup %1127 }
 0x104   : > { %v1427_v55 = vpop.eup %1129  ;;  %v733_v42 = vsub.f32 1.0, %v1424_v51 }
 0x105   : > { %v1429_v56 = vpop.eup %1131 }
 0x106   : > { %v1433_v61 = vpop.eup %1133  ;;  %v732_v49 = vsub.f32 1.0, %v1429_v56 }
 0x107   : > { %v1435_v0 = vpop.eup %1135 }
 0x108   : > { %v1439_v5 = vpop.eup %1137 }
 0x109   : > { %v1441_v7 = vpop.eup %1139 }
 0x10a   : > { %v1449_v23 = vpop.eup %1141 }
 0x155   : > { %v623_v52 = vpop.permute.xlu0 %622  ;;  %v631_v53 = vpop.permute.xlu1 %630 }
 0x156   : > { %v645_v54 = vmul.f32 %v1424_v51, %v623_v52  ;;  %v649_v59 = vmul.f32 %v1427_v55, %v631_v53  ;;  %v737_v52 = vsub.f32 1.0, %v1427_v55 }
 0x158   : > { %662 = vrot.lane.b32.xlu1 %v645_v54, %s1239_s16 }
 0x159   : > { %v621_v57 = vpop.permute.xlu0 %620  ;;  %v627_v58 = vpop.permute.xlu1 %626 }
 0x15a   : > { %v644_v60 = vmul.f32 %v1429_v56, %v621_v57  ;;  %v647_v3 = vmul.f32 %v1435_v0, %v627_v58 }
 0x15c   : > { %660 = vrot.lane.b32.xlu0 %v644_v60, %s1239_s16  ;;  %670 = vrot.lane.b32.xlu1 %v649_v59, %s1239_s16 }
 0x15d   : > { %v629_v1 = vpop.permute.xlu0 %628  ;;  %v625_v2 = vpop.permute.xlu1 %624 }
 0x15e   : > { %v648_v4 = vmul.f32 %v1433_v61, %v629_v1  ;;  %v646_v9 = vmul.f32 %v1441_v7, %v625_v2  ;;  %v736_v2 = vsub.f32 1.0, %v1433_v61 }
 0x160   : > { %668 = vrot.lane.b32.xlu0 %v648_v4, %s1239_s16  ;;  %666 = vrot.lane.b32.xlu1 %v647_v3, %s1239_s16 }
 0x161   : > { %v635_v8 = vpop.permute.xlu1 %634  ;;  %v633_v20 = vpop.permute.xlu0 %632 }
 0x162   : > { %v651_v19 = vmul.f32 %v1439_v5, %v635_v8  ;;  %v650_v27 = vmul.f32 %v1449_v23, %v633_v20  ;;  %v735_v8 = vsub.f32 1.0, %v1435_v0 }
 0x164   : > { %664 = vrot.lane.b32.xlu0 %v646_v9, %s1239_s16  ;;  %674 = vrot.lane.b32.xlu1 %v651_v19, %s1239_s16 }
 0x168   : > { %672 = vrot.lane.b32.xlu0 %v650_v27, %s1239_s16  ;;  %1097 = vrot.lane.b32.xlu1 %v1096_v22, %s1238_s15 }
 0x16c   : > { %1092 = vrot.lane.b32.xlu0 %v1351_v14, %s1238_s15  ;;  %1107 = vrot.lane.b32.xlu1 %v1106_v28, %s1238_s15 }
 0x170   : > { %1102 = vrot.lane.b32.xlu0 %v1354_v15, %s1238_s15 }
 0x1ca   : > { %v663_v6 = vpop.permute.xlu1 %662 }
 0x1cb   : > { %v685_v12 = vadd.f32 %v663_v6, %v1384_v62  ;;  %v734_v6 = vsub.f32 1.0, %v1441_v7 }
 0x1cd   : > { %1143 = vtanh.f32 %v685_v12 }
 0x1ce   : > { %v661_v16 = vpop.permute.xlu0 %660  ;;  %v671_v29 = vpop.permute.xlu1 %670 }
 0x1cf   : > { %v684_v30 = vadd.f32 %v661_v16, %v1392_v10  ;;  %v689_v31 = vadd.f32 %v671_v29, %v1386_v63  ;;  %v739_v29 = vsub.f32 1.0, %v1439_v5 }
 0x1d1   : > { %1145 = vtanh.f32 %v684_v30 }
 0x1d2   : > { %1147 = vtanh.f32 %v689_v31  ;;  %v669_v11 = vpop.permute.xlu0 %668  ;;  %v667_v13 = vpop.permute.xlu1 %666 }
 0x1d3   : > { %v688_v14 = vadd.f32 %v669_v11, %v1402_v24  ;;  %v687_v17 = vadd.f32 %v667_v13, %v1394_v18 }
 0x1d5   : > { %1149 = vtanh.f32 %v688_v14 }
 0x1d6   : > { %1151 = vtanh.f32 %v687_v17  ;;  %v665_v15 = vpop.permute.xlu0 %664  ;;  %v675_v32 = vpop.permute.xlu1 %674  ;;  %v738_v17 = vsub.f32 1.0, %v1449_v23 }
 0x1d7   : > { %v686_v62 = vadd.f32 %v665_v15, %v1396_v21  ;;  %v691_v33 = vadd.f32 %v675_v32, %v1404_v25 }
 0x1d9   : > { %1153 = vtanh.f32 %v686_v62 }
 0x1da   : > { %v1144_v10 = vpop.eup %1143  ;;  %1155 = vtanh.f32 %v691_v33  ;;  %v673_v63 = vpop.permute.xlu0 %672 }
 0x1db   : > { %v690_v34 = vadd.f32 %v673_v63, %v1406_v26  ;;  %750 = vrot.lane.b32.xlu1 %v1144_v10, %s1240_s17  ;;  %v1098_v37 = vpop.permute.xlu1 %1097 }
 0x1dc   : > { %v1100_v59 = vunpack.i.h.bf16 %v1098_v37  ;;  %v1099_v9 = vunpack.i.l.bf16 %v1098_v37 }
 0x1dd   : > { %1157 = vtanh.f32 %v690_v34 }
 0x1de   : > { %v1146_v24 = vpop.eup %1145  ;;  %v1093_v38 = vpop.permute.xlu0 %1092  ;;  %v727_v22 = vmul.f32 %v1435_v0, %v1100_v59  ;;  %v726_v30 = vmul.f32 %v1441_v7, %v1099_v9 }
 0x1df   : > { %v1148_v18 = vpop.eup %1147  ;;  %748 = vrot.lane.b32.xlu0 %v1146_v24, %s1240_s17  ;;  %v1108_v39 = vpop.permute.xlu1 %1107  ;;  %v1095_v40 = vunpack.i.h.bf16 %v1093_v38  ;;  %v1094_v45 = vunpack.i.l.bf16 %v1093_v38 }
 0x1e0   : > { %758 = vrot.lane.b32.xlu1 %v1148_v18, %s1240_s17  ;;  %v1110_v27 = vunpack.i.h.bf16 %v1108_v39 }
 0x1e1   : > { %v725_v44 = vmul.f32 %v1424_v51, %v1095_v40  ;;  %v724_v53 = vmul.f32 %v1429_v56, %v1094_v45 }
 0x1e2   : > { %v1150_v35 = vpop.eup %1149  ;;  %v1103_v41 = vpop.permute.xlu0 %1102  ;;  %v731_v0 = vmul.f32 %v1439_v5, %v1110_v27 }
 0x1e3   : > { %v1152_v21 = vpop.eup %1151  ;;  %756 = vrot.lane.b32.xlu0 %v1150_v35, %s1240_s17  ;;  %v1105_v47 = vunpack.i.h.bf16 %v1103_v41  ;;  %v1104_v54 = vunpack.i.l.bf16 %v1103_v41 }
 0x1e4   : > { %754 = vrot.lane.b32.xlu1 %v1152_v21, %s1240_s17 }
 0x1e5   : > { %v729_v60 = vmul.f32 %v1427_v55, %v1105_v47  ;;  %v728_v19 = vmul.f32 %v1433_v61, %v1104_v54  ;;  %v1109_v61 = vunpack.i.l.bf16 %v1108_v39 }
 0x1e6   : > { %v1154_v25 = vpop.eup %1153 }
 0x1e7   : > { %v1156_v36 = vpop.eup %1155  ;;  %752 = vrot.lane.b32.xlu0 %v1154_v25, %s1240_s17  ;;  %v730_v62 = vmul.f32 %v1449_v23, %v1109_v61 }
 0x1e8   : > { %762 = vrot.lane.b32.xlu1 %v1156_v36, %s1240_s17 }
 0x1ea   : > { %v1158_v26 = vpop.eup %1157 }
 0x1eb   : > { %760 = vrot.lane.b32.xlu0 %v1158_v26, %s1240_s17 }
 0x24d   : > { %v751_v43 = vpop.permute.xlu1 %750 }
 0x24e   : > { %v773_v46 = vmul.f32 %v751_v43, %v733_v42 }
 0x250   : > { %v781_v48 = vadd.f32 %v773_v46, %v725_v44 }
 0x251   : > { %v749_v50 = vpop.permute.xlu0 %748 }
 0x252   : > { %v772_v57 = vmul.f32 %v749_v50, %v732_v49  ;;  %v759_v58 = vpop.permute.xlu1 %758  ;;  %798 = vrot.lane.b32.xlu1 %v781_v48, %s1240_s17 }
 0x253   : > { %v777_v51 = vmul.f32 %v759_v58, %v737_v52 }
 0x254   : > { %v780_v1 = vadd.f32 %v772_v57, %v724_v53 }
 0x255   : > { %v785_v3 = vadd.f32 %v777_v51, %v729_v60  ;;  %v757_v4 = vpop.permute.xlu0 %756 }
 0x256   : > { %v776_v56 = vmul.f32 %v757_v4, %v736_v2  ;;  %v755_v20 = vpop.permute.xlu1 %754  ;;  %796 = vrot.lane.b32.xlu0 %v780_v1, %s1240_s17 }
 0x257   : > { %v775_v28 = vmul.f32 %v755_v20, %v735_v8  ;;  %806 = vrot.lane.b32.xlu1 %v785_v3, %s1240_s17 }
 0x258   : > { %v784_v55 = vadd.f32 %v776_v56, %v728_v19 }
 0x259   : > { %v783_v12 = vadd.f32 %v775_v28, %v727_v22  ;;  %v753_v16 = vpop.permute.xlu0 %752 }
 0x25a   : > { %v774_v31 = vmul.f32 %v753_v16, %v734_v6  ;;  %v763_v11 = vpop.permute.xlu1 %762  ;;  %804 = vrot.lane.b32.xlu0 %v784_v55, %s1240_s17 }
 0x25b   : > { %v779_v13 = vmul.f32 %v763_v11, %v739_v29  ;;  %802 = vrot.lane.b32.xlu1 %v783_v12, %s1240_s17 }
 0x25c   : > { %v782_v14 = vadd.f32 %v774_v31, %v726_v30 }
 0x25d   : > { %v787_v15 = vadd.f32 %v779_v13, %v731_v0  ;;  %v761_v32 = vpop.permute.xlu0 %760 }
 0x25e   : > { %v778_v33 = vmul.f32 %v761_v32, %v738_v17  ;;  %800 = vrot.lane.b32.xlu0 %v782_v14, %s1240_s17 }
 0x25f   : > { %810 = vrot.lane.b32.xlu1 %v787_v15, %s1240_s17 }
 0x260   : > { %v786_v7 = vadd.f32 %v778_v33, %v730_v62 }
 0x262   : > { %808 = vrot.lane.b32.xlu0 %v786_v7, %s1240_s17 }
 0x2c4   : > { %v799_v5 = vpop.permute.xlu1 %798 }
 0x2c5   : > { %821 = vst.msk [vmem:[%s268_s27 + $0x8] sm:$0xff] %vm411_vm0, %v799_v5 }
 0x2c8   : > { %v797_v10 = vpop.permute.xlu0 %796 }
 0x2c9   : > { %820 = vst.msk [vmem:[%s268_s27] sm:$0xff] %vm411_vm0, %v797_v10  ;;  %v807_v63 = vpop.permute.xlu1 %806 }
 0x2ca   : > { %825 = vst.msk [vmem:[%s268_s27 + $0x28] sm:$0xff] %vm411_vm0, %v807_v63 }
 0x2cc   : > { %v805_v23 = vpop.permute.xlu0 %804 }
 0x2cd   : > { %824 = vst.msk [vmem:[%s268_s27 + $0x20] sm:$0xff] %vm411_vm0, %v805_v23  ;;  %v803_v34 = vpop.permute.xlu1 %802 }
 0x2ce   : > { %823 = vst.msk [vmem:[%s268_s27 + $0x18] sm:$0xff] %vm411_vm0, %v803_v34 }
 0x2d0   : > { %v801_v24 = vpop.permute.xlu0 %800 }
 0x2d1   : > { %v811_v18 = vpop.permute.xlu1 %810  ;;  %822 = vst.msk [vmem:[%s268_s27 + $0x10] sm:$0xff] %vm411_vm0, %v801_v24 }
 0x2d2   : > { %827 = vst.msk [vmem:[%s268_s27 + $0x38] sm:$0xff] %vm411_vm0, %v811_v18 }
 0x2d4   : > { %v809_v35 = vpop.permute.xlu0 %808 }
 0x2d5   : > { %826 = vst.msk [vmem:[%s268_s27 + $0x30] sm:$0xff] %vm411_vm0, %v809_v35 }
 0x2d6   : > { %1172 = shalt.err (!%p1169_p6)
}
 0x2d7   : > { %s1173_s15 = scalar_lea.hbm %s1514_s10, 1024  ;;  %s1177_s24 = scalar_lea.hbm %s1569_s5, 2048 }
 0x2d8   : > { %p1174_p7 = scmp.ne.s32.totalorder %s1514_s10, %s1173_s15  ;;  %p1178_p11 = scmp.lt.s32.totalorder %s1514_s10, %s1569_s5 }
 0x2d9   : > { %p1179_p12 = scmp.lt.s32.totalorder %s1177_s24, %s1173_s15 }
 0x2da   : > { %p1175_p9 = pnand %p1174_p7, %p1314_p4 }
 0x2db   : > { %p1180_p13 = por %p1179_p12, %p1178_p11 }
 0x2dc   : > { %p1176_p10 = pneg %p1175_p9 }
 0x2de   : > { %p1181_p0 = pnand %p1180_p13, %p1176_p10 }
 0x2e0   : > { %1184 = shalt.err (!%p1181_p0)
}
 0x2e1   : > { %s1242_s29 = smov 128   ;;  %s1243_s8 = smov 8  }
 0x2e2   : > { %1030 = dma.vmem_to_hbm [thread:$0]  (%p1314_p4), %s1516_s7, 1024, %s1514_s10, %s1519_s21, %s1242_s29, %s1242_s29, %s1243_s8  }
 0x2e3 PF: > { %p1036_p1 = scmp.ge.s32.totalorder %s1235_s23, 2  ;;  %s858_s9 = sand.u32 1, %s1215_s18  }
 0x2e4   : > { %s859_s11 = scalar_lea.sflag [#allocation3], %s858_s9 }
 0x2e5   : > { %p1033_p2 = pnand %p1036_p1, %p1321_p8 }
 0x2e7   : > { %p1034_p3 = pneg %p1033_p2 }
 0x2e9   : > { %1210 = dma.done.wait (%p1034_p3), %s859_s11, 1024  }
 0x2ea   : > { %1212 = vsyncadd (%p1034_p3), %s859_s11, 4294966272  ;;  %s18_s23 = sadd.s32 1, %s1235_s23   ;;  %s1572_s18 = smov %s1219_s19 }
 0x2eb   : > { %p15_p5 = scmp.ge.s32.totalorder %s18_s23, 4   ;;  %s1573_s19 = smov %s1223_s20 }
 0x2ec   : > { %s1574_s20 = smov %s1327_s6  ;;  %s1575_s21 = smov %s1231_s22 }
 0x2ed   : > { %s1576_s22 = smov %s1578_s26  ;;  %17 = sbr.rel (!%p15_p5) target bundleno = 4 (0x4), region = 81 }
 0x2f2   :  { %864 = vsyncpa [#allocation3], 1 }
 0x2f3   :  { %866 = vsyncpa [#allocation3 + $0x1], 1 }

</bundles_post_ra>
